<compile_context>
chip_gen: v6e
topology: v6e:2x2x1
jax: 0.10.0
libtpu: 0.0.40
codegen_flags: <defaults>
</compile_context>

<pallas_src>
import functools

import jax
import jax.numpy as jnp
from jax import lax
from jax.experimental import pallas as pl
from jax.experimental.pallas import tpu as pltpu


# --------------------------------------------------------------------------
# Kernel A: per-(batch, N-tile) partial statistics.  Each grid step writes its
# tile mean and tile-centered sum of squares; the robust combine is done in
# XLA (tiny data).  No accumulator -> both grid axes are fully parallel.
# --------------------------------------------------------------------------
def _bn_stats_kernel(x_ref, mu_ref, ss_ref):
    xt = x_ref[0]                                             # (tn, C) f32
    mu_t = jnp.sum(xt, axis=0, keepdims=True) * (1.0 / xt.shape[0])   # (1, C)
    d = xt - mu_t
    ss_t = jnp.sum(d * d, axis=0, keepdims=True)              # (1, C)
    # 8-sublane output blocks keep the (8, 128) BlockSpec rule satisfied.
    mu_ref[...] = jnp.broadcast_to(mu_t, mu_ref.shape)
    ss_ref[...] = jnp.broadcast_to(ss_t, ss_ref.shape)


# --------------------------------------------------------------------------
# Kernel B: fused (BN-folded) projection + online-softmax attention pooling.
# One grid step == (head-group g, batch b, N-tile nt); nt is the reduction.
# --------------------------------------------------------------------------
def _attn_pool_kernel(x_ref, wkq_ref, wv_ref, pmask_ref, o_ref,
                      m_sc, l_sc, ctx_sc, *, q_inv):
    nt = pl.program_id(2)

    @pl.when(nt == 0)
    def _():
        m_sc[...] = jnp.full_like(m_sc, -jnp.inf)
        l_sc[...] = jnp.zeros_like(l_sc)
        ctx_sc[...] = jnp.zeros_like(ctx_sc)

    xt = x_ref[0].astype(jnp.bfloat16)                        # (tn, C)

    # Attention logits for all heads/queries of this group in ONE matmul
    # (Wk @ Qmat and the BN scale are folded into wkq host-side).
    s = jnp.dot(xt, wkq_ref[0], preferred_element_type=jnp.float32)   # (tn, HQ)
    # Value projection (BN scale folded in as well).
    v = jnp.dot(xt, wv_ref[0], preferred_element_type=jnp.float32)    # (tn, Cg)

    # Online softmax over the keys (the N axis, tiled by the grid).
    m_prev = m_sc[...]                                        # (1, HQ)
    m_new = jnp.maximum(m_prev, jnp.max(s, axis=0, keepdims=True))
    alpha = jnp.exp(m_prev - m_new)                           # (1, HQ)
    p = jnp.exp(s - m_new)                                    # (tn, HQ) f32

    m_sc[...] = m_new
    l_sc[...] = alpha * l_sc[...] + jnp.sum(p, axis=0, keepdims=True)

    # ctx_tile = p^T @ v  (contract the N-tile axis) in bf16, f32 accumulate.
    ctx_tile = lax.dot_general(
        p.astype(jnp.bfloat16), v.astype(jnp.bfloat16),
        (((0,), (0,)), ((), ())),
        preferred_element_type=jnp.float32)                   # (HQ, Cg)

    # Rescale the running ctx rows by alpha via diag(alpha) @ ctx (tiny f32
    # matmul; avoids a lane->sublane broadcast of alpha).
    hq = m_sc.shape[1]
    rows = lax.broadcasted_iota(jnp.int32, (hq, hq), 0)
    cols = lax.broadcasted_iota(jnp.int32, (hq, hq), 1)
    diag_alpha = (rows == cols).astype(jnp.float32) * alpha   # (HQ, HQ)
    ctx_sc[...] = jnp.dot(diag_alpha, ctx_sc[...],
                          preferred_element_type=jnp.float32) + ctx_tile

    @pl.when(nt == pl.num_programs(2) - 1)
    def _():
        # softmax normalization (EUP reciprocal) + mean over the Q queries,
        # then select each channel's own head via the block mask.
        linv = pl.reciprocal(l_sc[...], approx=True) * q_inv  # (1, HQ)
        pooled = jnp.dot(linv, ctx_sc[...] * pmask_ref[0],
                         preferred_element_type=jnp.float32)  # (1, Cg)
        o_ref[...] = pooled.reshape(o_ref.shape).astype(o_ref.dtype)


# --------------------------------------------------------------------------
# Helpers / wrapper
# --------------------------------------------------------------------------
def _pick_rows(n, requested=None, max_rows=512):
    """Largest N-tile that divides n, is a multiple of 8 (or the full n)."""
    if requested is not None and n % requested == 0 and \
            (requested % 8 == 0 or requested == n):
        return requested
    start = (min(n, max_rows) // 8) * 8
    for t in range(start, 7, -8):
        if n % t == 0:
            return t
    return n                                                  # full-N fallback


def attention_pooling_forward(x, w_k, w_v, cls_token, *, num_heads,
                              num_groups=1, eps=1e-6, qk_scale=None,
                              running_mean=None, running_var=None,
                              block_rows=None):
    """x: (B, N, C); w_k, w_v: (C, C) with y = x @ W (i.e. torch weight.T);
    cls_token: (Q, C)."""
    out_dtype = x.dtype
    x = x.astype(jnp.float32)
    B, N, C = x.shape
    Q = cls_token.shape[0]
    H = num_heads
    Dh = C // H
    G = num_groups
    assert H % G == 0 and C == H * Dh and C % G == 0
    Hg = H // G
    Cg = C // G
    HQ = Hg * Q
    scale = qk_scale if qk_scale is not None else Dh ** -0.5
    vmem_limit = 48 * 1024 * 1024                             # < 64 MiB (v7x)

    # ---- BatchNorm statistics -------------------------------------------
    if running_mean is not None and running_var is not None:
        # Eval-mode path: skip the stats pass entirely (x read only once).
        mean = jnp.asarray(running_mean, jnp.float32).reshape(1, C)
        var = jnp.asarray(running_var, jnp.float32).reshape(1, C)
    else:
        tn_s = _pick_rows(N, block_rows)
        nt_s = N // tn_s
        mu_t, ss_t = pl.pallas_call(
            _bn_stats_kernel,
            out_shape=(jax.ShapeDtypeStruct((B, nt_s, 8, C), jnp.float32),
                       jax.ShapeDtypeStruct((B, nt_s, 8, C), jnp.float32)),
            grid_spec=pltpu.PrefetchScalarGridSpec(
                num_scalar_prefetch=0,
                grid=(B, nt_s),
                in_specs=[pl.BlockSpec((1, tn_s, C), lambda b, t: (b, t, 0))],
                out_specs=(pl.BlockSpec((1, 1, 8, C), lambda b, t: (b, t, 0, 0)),
                           pl.BlockSpec((1, 1, 8, C), lambda b, t: (b, t, 0, 0)))),
            compiler_params=pltpu.CompilerParams(
                dimension_semantics=("parallel", "parallel"),
                vmem_limit_bytes=vmem_limit),
        )(x)
        mu_t = mu_t[:, :, 0, :]                               # (B, nt_s, C)
        ss_t = ss_t[:, :, 0, :]
        # Exact, cancellation-free combine (within-tile SS + between-tile SS).
        mean = jnp.mean(mu_t, axis=(0, 1))                    # equal tile counts
        between = jnp.sum((mu_t - mean) ** 2, axis=(0, 1)) * float(tn_s)
        var = (jnp.sum(ss_t, axis=(0, 1)) + between) / float(B * N)
        mean = mean.reshape(1, C)
        var = var.reshape(1, C)

    inv_std = lax.rsqrt(var + eps)                            # (1, C)
    istd_col = inv_std.reshape(C, 1)

    # ---- Host-side weight prep: fold BN scale, fuse Wk @ Qmat, cast bf16 --
    wk_s = w_k.astype(jnp.float32) * istd_col                 # (C, C)
    wv_s = w_v.astype(jnp.float32) * istd_col                 # (C, C)

    cls_scaled = (cls_token.astype(jnp.float32) * scale).reshape(Q, H, Dh)
    qm = cls_scaled.transpose(1, 2, 0).reshape(G, Hg, Dh, Q)  # (G, Hg, Dh, Q)
    eye_h = jnp.eye(Hg, dtype=jnp.float32)
    # Block-diagonal query matrix per group: (G, Cg, Hg*Q), scale applied.
    qmat_g = jnp.einsum('ghdq,hj->ghdjq', qm, eye_h).reshape(G, Cg, HQ)

    wk_g = wk_s.reshape(C, G, Cg).transpose(1, 0, 2)          # (G, C, Cg)
    wkq_g = jnp.einsum('gck,gkq->gcq', wk_g, qmat_g).astype(jnp.bfloat16)  # (G,C,HQ)
    wv_g = wv_s.reshape(C, G, Cg).transpose(1, 0, 2).astype(jnp.bfloat16)  # (G,C,Cg)

    # Head-selection mask for the pooled context (1.0 on own-head blocks).
    pmask = jnp.einsum('hj,q,d->hqjd', eye_h,
                       jnp.ones((Q,), jnp.float32),
                       jnp.ones((Dh,), jnp.float32)).reshape(HQ, Cg)
    pmask_g = jnp.tile(pmask[None], (G, 1, 1))                # (G, HQ, Cg)

    # ---- Fused projection + online-softmax pooling ------------------------
    tn = _pick_rows(N, block_rows)
    kernel = functools.partial(_attn_pool_kernel, q_inv=1.0 / float(Q))
    pooled = pl.pallas_call(
        kernel,
        out_shape=jax.ShapeDtypeStruct((G, B, 1, Cg), jnp.float32),
        grid_spec=pltpu.PrefetchScalarGridSpec(
            num_scalar_prefetch=0,
            grid=(G, B, N // tn),
            in_specs=[
                pl.BlockSpec((1, tn, C), lambda g, b, t: (b, t, 0)),     # x
                pl.BlockSpec((1, C, HQ), lambda g, b, t: (g, 0, 0)),     # Wkq
                pl.BlockSpec((1, C, Cg), lambda g, b, t: (g, 0, 0)),     # Wv
                pl.BlockSpec((1, HQ, Cg), lambda g, b, t: (g, 0, 0)),    # mask
            ],
            out_specs=pl.BlockSpec((1, 1, 1, Cg), lambda g, b, t: (g, b, 0, 0)),
            scratch_shapes=[pltpu.VMEM((1, HQ), jnp.float32),   # running max
                            pltpu.VMEM((1, HQ), jnp.float32),   # running sum
                            pltpu.VMEM((HQ, Cg), jnp.float32)]),  # running ctx
        compiler_params=pltpu.CompilerParams(
            dimension_semantics=("arbitrary", "parallel", "arbitrary"),
            vmem_limit_bytes=vmem_limit),
    )(x, wkq_g, wv_g, pmask_g)

    out = pooled.reshape(G, B, Cg).transpose(1, 0, 2).reshape(B, C)
    # v-side BN mean bias: constant over keys; softmax weights sum to 1, so it
    # is subtracted once per channel in plain XLA.
    bias_v = (mean * inv_std) @ w_v.astype(jnp.float32)       # (1, C)
    return (out - bias_v).astype(out_dtype)
    # TODO(synk): the per-call batch-dependent `cls` override (cls is not None
    # branch) is not supported by this weight folding; only the cls_token
    # parameter path is implemented.


# --------------------------------------------------------------------------
# Plain-JAX reference mirroring the PyTorch forward (f32).
# --------------------------------------------------------------------------
def _reference(x, w_k, w_v, cls_token, *, num_heads, eps=1e-6, qk_scale=None):
    B, N, C = x.shape
    Q = cls_token.shape[0]
    Dh = C // num_heads
    scale = qk_scale if qk_scale is not None else Dh ** -0.5
    mean = x.mean(axis=(0, 1))
    var = x.var(axis=(0, 1))                 # biased, as BN uses for normalization
    xn = (x - mean) / jnp.sqrt(var + eps)
    k = xn @ w_k
    v = xn @ w_v
    q = jnp.broadcast_to(cls_token[None], (B, Q, C))
    q = q.reshape(B, Q, num_heads, Dh).transpose(0, 2, 1, 3) * scale
    kh = k.reshape(B, N, num_heads, Dh).transpose(0, 2, 1, 3)
    vh = v.reshape(B, N, num_heads, Dh).transpose(0, 2, 1, 3)
    attn = jax.nn.softmax(jnp.einsum('bhqd,bhkd->bhqk', q, kh), axis=-1)
    ctx = jnp.einsum('bhqk,bhkd->bhqd', attn, vh)
    return ctx.transpose(0, 2, 1, 3).reshape(B, Q, C).mean(axis=1)


if __name__ == "__main__":
    B, N, C, H, Q = 2, 64, 256, 8, 2                           # Dh = 32

    key = jax.random.PRNGKey(0)
    kx, kk, kv, kc = jax.random.split(key, 4)
    x = jax.random.normal(kx, (B, N, C), dtype=jnp.float32)
    # Deterministic synthetic parameters (y = x @ W convention).
    w_k = jax.random.normal(kk, (C, C), dtype=jnp.float32) * (C ** -0.5)
    w_v = jax.random.normal(kv, (C, C), dtype=jnp.float32) * (C ** -0.5)
    cls_token = jax.random.normal(kc, (Q, C), dtype=jnp.float32) * 0.02

    ref = _reference(x, w_k, w_v, cls_token, num_heads=H)

    # Config 1: training-mode stats, forced N tiling (exercises the
    # online-softmax accumulation across N tiles).
    out1 = jax.block_until_ready(
        attention_pooling_forward(x, w_k, w_v, cls_token, num_heads=H,
                                  num_groups=1, block_rows=32))
    assert out1.shape == (B, C)
    err1 = float(jnp.max(jnp.abs(out1 - ref)))
    assert jnp.allclose(out1, ref, atol=2e-2, rtol=2e-2), \
        f"config1 mismatch vs reference: max abs diff {err1}"

    # Config 2: two head groups + eval-mode running statistics.
    r_mean = jnp.mean(x, axis=(0, 1))
    r_var = jnp.var(x, axis=(0, 1))
    out2 = jax.block_until_ready(
        attention_pooling_forward(x, w_k, w_v, cls_token, num_heads=H,
                                  num_groups=2,
                                  running_mean=r_mean, running_var=r_var))
    err2 = float(jnp.max(jnp.abs(out2 - ref)))
    assert jnp.allclose(out2, ref, atol=2e-2, rtol=2e-2), \
        f"config2 mismatch vs reference: max abs diff {err2}"

    print("KERNEL_OK")
</pallas_src>

<mosaic_0001>
module attributes {stable_mosaic.version = 11 : i64} {
  func.func @_bn_stats_kernel(%arg0: i32, %arg1: i32, %arg2: memref<1x32x256xf32, #tpu.memory_space<vmem>>, %arg3: memref<1x1x8x256xf32, #tpu.memory_space<vmem>>, %arg4: memref<1x1x8x256xf32, #tpu.memory_space<vmem>>) attributes {dimension_semantics = [#tpu.dimension_semantics<parallel>, #tpu.dimension_semantics<parallel>], iteration_bounds = array<i64: 2, 2>, scalar_prefetch = 0 : i64, scratch_operands = 0 : i64, tpu.core_type = #tpu.core_type<tc>, window_params = [{transform_indices = @transform_0, window_bounds = array<i64: 1, 32, 256>}, {transform_indices = @transform_1, window_bounds = array<i64: 1, 1, 8, 256>}, {transform_indices = @transform_2, window_bounds = array<i64: 1, 1, 8, 256>}]} {
    %c0 = arith.constant 0 : index
    %c0_0 = arith.constant 0 : index
    %c0_1 = arith.constant 0 : index
    %0 = vector.load %arg2[%c0, %c0_0, %c0_1] : memref<1x32x256xf32, #tpu.memory_space<vmem>>, vector<1x32x256xf32>
    %1 = vector.shape_cast %0 : vector<1x32x256xf32> to vector<32x256xf32>
    %cst = arith.constant dense<0.000000e+00> : vector<256xf32>
    %2 = vector.multi_reduction <add>, %1, %cst [0] : vector<32x256xf32> to vector<256xf32>
    %3 = vector.shape_cast %2 : vector<256xf32> to vector<1x256xf32>
    %cst_2 = arith.constant 3.125000e-02 : f32
    %4 = vector.broadcast %cst_2 : f32 to vector<1x256xf32>
    %5 = arith.mulf %3, %4 : vector<1x256xf32>
    %6 = vector.broadcast %5 : vector<1x256xf32> to vector<32x256xf32>
    %7 = arith.subf %1, %6 : vector<32x256xf32>
    %8 = arith.mulf %7, %7 : vector<32x256xf32>
    %cst_3 = arith.constant dense<0.000000e+00> : vector<256xf32>
    %9 = vector.multi_reduction <add>, %8, %cst_3 [0] : vector<32x256xf32> to vector<256xf32>
    %10 = vector.shape_cast %9 : vector<256xf32> to vector<1x256xf32>
    %11 = vector.shape_cast %5 : vector<1x256xf32> to vector<1x1x1x256xf32>
    %12 = vector.broadcast %11 : vector<1x1x1x256xf32> to vector<1x1x8x256xf32>
    %c0_4 = arith.constant 0 : index
    %c0_5 = arith.constant 0 : index
    %c0_6 = arith.constant 0 : index
    %c0_7 = arith.constant 0 : index
    %13 = vector.load %arg3[%c0_4, %c0_5, %c0_6, %c0_7] : memref<1x1x8x256xf32, #tpu.memory_space<vmem>>, vector<1x1x8x256xf32>
    tpu.vector_store %arg3[%c0_4, %c0_5, %c0_6, %c0_7], %12 {strides = array<i32>} : memref<1x1x8x256xf32, #tpu.memory_space<vmem>>, vector<1x1x8x256xf32>,
    %14 = vector.shape_cast %10 : vector<1x256xf32> to vector<1x1x1x256xf32>
    %15 = vector.broadcast %14 : vector<1x1x1x256xf32> to vector<1x1x8x256xf32>
    %c0_8 = arith.constant 0 : index
    %c0_9 = arith.constant 0 : index
    %c0_10 = arith.constant 0 : index
    %c0_11 = arith.constant 0 : index
    %16 = vector.load %arg4[%c0_8, %c0_9, %c0_10, %c0_11] : memref<1x1x8x256xf32, #tpu.memory_space<vmem>>, vector<1x1x8x256xf32>
    tpu.vector_store %arg4[%c0_8, %c0_9, %c0_10, %c0_11], %15 {strides = array<i32>} : memref<1x1x8x256xf32, #tpu.memory_space<vmem>>, vector<1x1x8x256xf32>,
    return
  }
  func.func @transform_0(%arg0: i32, %arg1: i32) -> (i32, i32, i32) {
    %c0_i32 = arith.constant 0 : i32
    %c0_i32_0 = arith.constant 0 : i32
    return %arg0, %arg1, %c0_i32 : i32, i32, i32
  }
  func.func @transform_1(%arg0: i32, %arg1: i32) -> (i32, i32, i32, i32) {
    %c0_i32 = arith.constant 0 : i32
    %c0_i32_0 = arith.constant 0 : i32
    %c0_i32_1 = arith.constant 0 : i32
    return %arg0, %arg1, %c0_i32, %c0_i32_0 : i32, i32, i32, i32
  }
  func.func @transform_2(%arg0: i32, %arg1: i32) -> (i32, i32, i32, i32) {
    %c0_i32 = arith.constant 0 : i32
    %c0_i32_0 = arith.constant 0 : i32
    %c0_i32_1 = arith.constant 0 : i32
    return %arg0, %arg1, %c0_i32, %c0_i32_0 : i32, i32, i32, i32
  }
}

</mosaic_0001>

<bundles_post_ra>
// kernel: tpu_custom_call.1
= control target key start
LH: loop header
LB: loop body
LE: loop exit
PB: predicated region body
PF: predicated region fallthrough
CT: control target
= control target key end

     0   :  { %8 = vsyncpa [#allocation3], 0  ;;  %s904_s0 = inlined_call_operand.hbm [shape: f32[2,64,256], index: 0, kind: input, shape index: {}]   ;;  %s905_s1 = inlined_call_operand.hbm [shape: f32[2,2,8,256], index: 1, kind: output, shape index: {0}]   ;;  %s906_s2 = inlined_call_operand.hbm [shape: f32[2,2,8,256], index: 2, kind: output, shape index: {1}]  }
   0x1   :  { %10 = vsyncpa [#allocation3 + $0x1], 0 }
   0x2   :  { %11 = vsyncpa [#allocation4], 0 }
   0x3   :  { %13 = vsyncpa [#allocation4 + $0x1], 0 }
   0x4   :  { %14 = vsyncpa [#allocation7], 0 }
   0x5   :  { %16 = vsyncpa [#allocation7 + $0x1], 0  ;;  %s706_s9 = smov 0   ;;  %s708_s10 = smov 0  }
   0x6   :  { %s710_s11 = smov 0   ;;  %s712_s12 = smov 0  }
   0x7   :  { %s714_s13 = smov 0   ;;  %s716_s14 = smov 0  }
   0x8   :  { %s718_s15 = smov 0   ;;  %s720_s16 = smov 0  }
   0x9 LB: > { %s421_s17 = sadd.s32 4294967295, %s684_s16   ;;  %s422_s18 = sadd.s32 4294967294, %s684_s16   ;;  %s684_s16 = sphi %s720_s16, %s22_s16   ;;  %s680_s15 = sphi %s718_s15, %s921_s15   ;;  %s676_s14 = sphi %s716_s14, %s920_s14   ;;  %s672_s13 = sphi %s714_s13, %s919_s13   ;;  %s668_s12 = sphi %s712_s12, %s918_s12   ;;  %s664_s11 = sphi %s710_s11, %s917_s11   ;;  %s660_s10 = sphi %s708_s10, %s916_s10   ;;  %s656_s9 = sphi %s706_s9, %s915_s9  }
   0xa   : > { %s31_s19 = sadd.s32 1, %s676_s14  ;;  %s34_s20 = sadd.s32 1, %s680_s15 }
   0xb   : > { %p32_p0 = scmp.ge.s32.totalorder %s31_s19, 2  ;;  %s43_s21 = sadd.s32 1, %s664_s11 }
   0xc   : > { %p50_p1 = scmp.ne.s32.totalorder %s664_s11, %s660_s10  ;;  %p51_p2 = scmp.eq.s32.totalorder %s684_s16, 0 }
   0xd   : > { %s923_s19 = smov (%p32_p0, %s31_s19), 0  ;;  %s925_s20 = smov (!%p32_p0, %s34_s20), %s680_s15 }
   0xe   : > { %s39_s22 = ssub.s32 %s676_s14, %s923_s19  ;;  %p759_p3 = por %p51_p2, %p50_p1 }
   0xf   : > { %p36_p4 = scmp.ge.s32.totalorder %s925_s20, 2  ;;  %p56_p5 = scmp.ne.s32.totalorder %s660_s10, %s656_s9 }
  0x10   : > { %p57_p6 = scmp.eq.s32.totalorder %s421_s17, 0  ;;  %p82_p7 = scmp.eq.s32.totalorder %s421_s17, 3 }
  0x11   : > { %s927_s20 = smov (%p36_p4, %s925_s20), 0  ;;  %p88_p10 = scmp.eq.s32.totalorder %s422_s18, 3 }
  0x12   : > { %909 = sst [smem:[#allocation11_spill]] %s927_s20  ;;  %p767_p8 = por %p57_p6, %p56_p5 }
  0x13   : > { %p771_p9 = por %p82_p7, %p50_p1  ;;  %s38_s26 = ssub.s32 %s680_s15, %s927_s20 }
  0x14   : > { %s40_s27 = sor.u32 %s39_s22, %s38_s26  ;;  %p777_p12 = por %p88_p10, %p56_p5 }
  0x15   : > { %p41_p11 = scmp.eq.s32.totalorder %s40_s27, 0  ;;  %p462_p13 = scmp.lt.s32.totalorder %s684_s16, 4 }
  0x16   : > { %s136_s29 = sand.u32 1, %s664_s11   ;;  %s444_s4 = sshll.u32 %s676_s14, 3 }
  0x17   : > { %s784_s30 = scalar_select %p41_p11, %s664_s11, %s43_s21  }
  0x18   : > { %s425_s3 = sshll.u32 %s136_s29, 6  ;;  %s428_s5 = sshll.u32 %s680_s15, 4 }
  0x19   : > { %s140_s6 = scalar_lea.vmem [#allocation2], %s425_s3  ;;  %s147_s8 = sadd.s32 %s444_s4, %s428_s5 }
  0x1a   : > { %s150_s7 = sshll.u32 %s140_s6, 4  ;;  %s429_s17 = sshll.u32 %s147_s8, 7  ;;  %s151_s7 = int_to_ptr.vmem [resolvable:$true] %s150_s7 }
  0x1b   : > { %p790_p0 = pnand %p462_p13, %p759_p3  ;;  %s149_s27 = scalar_lea.hbm %s904_s0, %s429_s17 }
  0x1c   : > { %s137_s21 = scalar_lea.sflag [#allocation3], %s136_s29  ;;  %s543_s20 = scalar_lea.vmem %s151_s7, 1024 }
  0x1d   : > { %p532_p1 = pneg %p790_p0  ;;  %p544_p2 = scmp.ne.s32.totalorder %s151_s7, %s543_s20 }
  0x1e   : > { %s686_s3 = smov [#allocation2]  }
  0x1f   : > { %p546_p4 = pnand %p544_p2, %p532_p1  ;;  %s548_s4 = sshll.u32 %s686_s3, 4  ;;  %s549_s4 = int_to_ptr.vmem [resolvable:$false] %s548_s4 }
  0x20   : > { %s550_s23 = scalar_lea.vmem %s549_s4, 2048  ;;  %p551_p3 = scmp.lt.s32.totalorder %s151_s7, %s549_s4 }
  0x21   : > { %p547_p5 = pneg %p546_p4  ;;  %p552_p6 = scmp.lt.s32.totalorder %s550_s23, %s543_s20 }
  0x23   : > { %p553_p7 = por %p552_p6, %p551_p3 }
  0x25   : > { %p554_p10 = pnand %p553_p7, %p547_p5 }
  0x27   : > { %557 = shalt.err (!%p554_p10)
}
  0x28   : > { %s687_s5 = smov 256   ;;  %s688_s29 = smov 16  }
  0x29   : > { %454 = dma.hbm_to_vmem [thread:$0]  (!%p790_p0), %s149_s27, 1024, %s151_s7, %s137_s21, %s687_s5, %s687_s5, %s688_s29  }
  0x2a   : > { %p430_p11 = scmp.ge.s32.totalorder %s684_s16, 1  ;;  %p158_p13 = scmp.lt.s32.totalorder %s684_s16, 5 }
  0x2c   : > { %p159_p1 = pnand %p430_p11, %p158_p13 }
  0x2d   : > { %s804_s6 = sand.u32 (!%p159_p1), 1, %s660_s10  }
  0x2e   : > { %162 = sbr.rel (%p159_p1) target bundleno = 120 (0x78), region = 24  ;;  %s431_s20 = sshll.u32 (!%p159_p1), %s804_s6, 6 }
  0x2f   : > { %s165_s8 = scalar_lea.sflag (!%p159_p1), [#allocation3], %s804_s6  ;;  %s168_s17 = scalar_lea.vmem (!%p159_p1), [#allocation2], %s431_s20 }
  0x33   : > { %643 = dma.done.wait (%p767_p8), %s165_s8, 1024  }
  0x34   : > { %645 = vsyncadd (%p767_p8), %s165_s8, 4294966272  ;;  %v195_v0 = vld [vmem:[%s168_s17] sm:$0xff]  ;;  %v197_v1 = vld [vmem:[%s168_s17 + $0x10] sm:$0xff]  ;;  %s432_s24 = sshll.u32 %s804_s6, 4  ;;  %s436_s7 = sshll.u32 %s668_s12, 1 }
  0x35   : > { %v199_v2 = vld [vmem:[%s168_s17 + $0x20] sm:$0xff]  ;;  %v203_v3 = vadd.f32 %v197_v1, %v195_v0  ;;  %v196_v4 = vld [vmem:[%s168_s17 + $0x8] sm:$0xff]  ;;  %v198_v5 = vld [vmem:[%s168_s17 + $0x18] sm:$0xff]  ;;  %s437_s18 = sshll.u32 %s672_s13, 2  ;;  %s186_s26 = scalar_lea.vmem [#allocation5], %s432_s24 }
  0x36   : > { %v201_v6 = vld [vmem:[%s168_s17 + $0x30] sm:$0xff]  ;;  %v200_v7 = vld [vmem:[%s168_s17 + $0x28] sm:$0xff]  ;;  %v212_v8 = vadd.f32 %v198_v5, %v196_v4  ;;  %v202_v10 = vld [vmem:[%s168_s17 + $0x38] sm:$0xff]  ;;  %s815_s22 = sadd.s32 %s437_s18, %s436_s7  ;;  %s283_s27 = sshll.u32 %s186_s26, 4  ;;  %s820_s27 = int_to_ptr.vmem [resolvable:$true] %s283_s27 }
  0x37   : > { %v204_v9 = vadd.f32 %v203_v3, %v199_v2  ;;  %s438_s21 = sshll.u32 %s815_s22, 7  ;;  %s262_s4 = scalar_lea.sflag [#allocation4], %s804_s6 }
  0x38   : > { %v213_v11 = vadd.f32 %v212_v8, %v200_v7  ;;  %s827_s3 = scalar_lea.hbm %s905_s1, %s438_s21  ;;  %s558_s23 = scalar_lea.vmem %s820_s27, 256 }
  0x39   : > { %v205_v12 = vadd.f32 %v204_v9, %v201_v6  ;;  %p559_p8 = scmp.ne.s32.totalorder %s820_s27, %s558_s23  ;;  %s689_s5 = smov [#allocation5]  }
  0x3a   : > { %v214_v13 = vadd.f32 %v213_v11, %v202_v10  ;;  %s562_s29 = sshll.u32 %s689_s5, 4  ;;  %s563_s29 = int_to_ptr.vmem [resolvable:$false] %s562_s29 }
  0x3b   : > { %v206_v14 = vrot.slane %v205_v12, 4  ;;  %p560_p0 = pnand %p559_p8, %p771_p9  ;;  %s564_s20 = scalar_lea.vmem %s563_s29, 512 }
  0x3c   : > { %v215_v15 = vrot.slane %v214_v13, 4  ;;  %p565_p4 = scmp.lt.s32.totalorder %s820_s27, %s563_s29  ;;  %p566_p5 = scmp.lt.s32.totalorder %s564_s20, %s558_s23 }
  0x3d   : > { %v207_v16 = vadd.f32 %v206_v14, %v205_v12  ;;  %p561_p2 = pneg %p560_p0 }
  0x3e   : > { %v216_v17 = vadd.f32 %v215_v15, %v214_v13  ;;  %p567_p3 = por %p566_p5, %p565_p4 }
  0x3f   : > { %v208_v18 = vrot.slane %v207_v16, 2 }
  0x40   : > { %v217_v19 = vrot.slane %v216_v17, 2  ;;  %p568_p6 = pnand %p567_p3, %p561_p2 }
  0x41   : > { %v209_v20 = vadd.f32 %v208_v18, %v207_v16 }
  0x42   : > { %v218_v21 = vadd.f32 %v217_v19, %v216_v17 }
  0x43   : > { %v210_v22 = vrot.slane %v209_v20, 1 }
  0x44   : > { %v219_v23 = vrot.slane %v218_v21, 1 }
  0x45   : > { %v211_v24 = vadd.f32 %v210_v22, %v209_v20 }
  0x46   : > { %v220_v25 = vadd.f32 %v219_v23, %v218_v21 }
  0x47   : > { %v221_v26 = vmul.f32 0.03125, %v211_v24 }
  0x48   : > { %v222_v27 = vmul.f32 0.03125, %v220_v25 }
  0x49   : > { %257 = vst [vmem:[%s186_s26] sm:$0xff] %v221_v26  ;;  %v223_v28 = vsub.f32 %v195_v0, %v221_v26  ;;  %v225_v29 = vsub.f32 %v197_v1, %v221_v26  ;;  %v227_v30 = vsub.f32 %v199_v2, %v221_v26  ;;  %v229_v31 = vsub.f32 %v201_v6, %v221_v26 }
  0x4a   : > { %258 = vst [vmem:[%s186_s26 + $0x8] sm:$0xff] %v222_v27  ;;  %v224_v32 = vsub.f32 %v196_v4, %v222_v27  ;;  %v226_v33 = vsub.f32 %v198_v5, %v222_v27  ;;  %v228_v34 = vsub.f32 %v200_v7, %v222_v27  ;;  %v230_v35 = vsub.f32 %v202_v10, %v222_v27 }
  0x4b   : > { %v231_v36 = vmul.f32 %v223_v28, %v223_v28  ;;  %v233_v37 = vmul.f32 %v225_v29, %v225_v29  ;;  %v235_v38 = vmul.f32 %v227_v30, %v227_v30 }
  0x4c   : > { %571 = shalt.err (!%p568_p6)
}
  0x4d   : > { %s572_s8 = scalar_lea.hbm %s827_s3, 256  ;;  %s576_s18 = scalar_lea.hbm %s905_s1, 1024 }
  0x4e   : > { %p573_p7 = scmp.ne.s32.totalorder %s827_s3, %s572_s8  ;;  %p577_p13 = scmp.lt.s32.totalorder %s827_s3, %s905_s1 }
  0x4f   : > { %p578_p1 = scmp.lt.s32.totalorder %s576_s18, %s572_s8 }
  0x50   : > { %p574_p10 = pnand %p573_p7, %p771_p9 }
  0x51   : > { %p579_p8 = por %p578_p1, %p577_p13 }
  0x52   : > { %p575_p11 = pneg %p574_p10 }
  0x54   : > { %p580_p0 = pnand %p579_p8, %p575_p11 }
  0x56   : > { %583 = shalt.err (!%p580_p0)
}
  0x57   : > { %447 = dma.vmem_to_hbm [thread:$0]  (%p771_p9), %s820_s27, 256, %s827_s3, %s262_s4   ;;  %v232_v39 = vmul.f32 %v224_v32, %v224_v32  ;;  %v234_v40 = vmul.f32 %v226_v33, %v226_v33  ;;  %v236_v41 = vmul.f32 %v228_v34, %v228_v34  ;;  %v237_v42 = vmul.f32 %v229_v31, %v229_v31 }
  0x58   : > { %v239_v43 = vadd.f32 %v233_v37, %v231_v36  ;;  %v238_v44 = vmul.f32 %v230_v35, %v230_v35  ;;  %s193_s27 = scalar_lea.vmem [#allocation6], %s432_s24  ;;  %s297_s23 = scalar_lea.hbm %s906_s2, %s438_s21 }
  0x59   : > { %v248_v45 = vadd.f32 %v234_v40, %v232_v39  ;;  %s299_s13 = sshll.u32 %s193_s27, 4  ;;  %s267_s5 = scalar_lea.sflag [#allocation7], %s804_s6  ;;  %s852_s13 = int_to_ptr.vmem [resolvable:$true] %s299_s13 }
  0x5a   : > { %v240_v46 = vadd.f32 %v239_v43, %v235_v38  ;;  %s584_s24 = scalar_lea.vmem %s852_s13, 256  ;;  %s690_s29 = smov [#allocation6]  }
  0x5b   : > { %v249_v47 = vadd.f32 %v248_v45, %v236_v41  ;;  %p585_p2 = scmp.ne.s32.totalorder %s852_s13, %s584_s24  ;;  %s588_s20 = sshll.u32 %s690_s29, 4  ;;  %s589_s20 = int_to_ptr.vmem [resolvable:$false] %s588_s20 }
  0x5c   : > { %v241_v48 = vadd.f32 %v240_v46, %v237_v42  ;;  %s590_s8 = scalar_lea.vmem %s589_s20, 512  ;;  %p591_p3 = scmp.lt.s32.totalorder %s852_s13, %s589_s20 }
  0x5d   : > { %v250_v49 = vadd.f32 %v249_v47, %v238_v44  ;;  %p586_p4 = pnand %p585_p2, %p771_p9  ;;  %p592_p6 = scmp.lt.s32.totalorder %s590_s8, %s584_s24 }
  0x5e   : > { %v242_v50 = vrot.slane %v241_v48, 4 }
  0x5f   : > { %v251_v51 = vrot.slane %v250_v49, 4  ;;  %p587_p5 = pneg %p586_p4  ;;  %p593_p7 = por %p592_p6, %p591_p3 }
  0x60   : > { %v243_v52 = vadd.f32 %v242_v50, %v241_v48 }
  0x61   : > { %v252_v53 = vadd.f32 %v251_v51, %v250_v49  ;;  %p594_p10 = pnand %p593_p7, %p587_p5 }
  0x62   : > { %v244_v54 = vrot.slane %v243_v52, 2 }
  0x63   : > { %v253_v55 = vrot.slane %v252_v53, 2 }
  0x64   : > { %v245_v56 = vadd.f32 %v244_v54, %v243_v52 }
  0x65   : > { %v254_v57 = vadd.f32 %v253_v55, %v252_v53 }
  0x66   : > { %v246_v58 = vrot.slane %v245_v56, 1 }
  0x67   : > { %v255_v59 = vrot.slane %v254_v57, 1 }
  0x68   : > { %v247_v60 = vadd.f32 %v246_v58, %v245_v56 }
  0x69   : > { %v256_v61 = vadd.f32 %v255_v59, %v254_v57 }
  0x6a   : > { %259 = vst [vmem:[%s193_s27] sm:$0xff] %v247_v60 }
  0x6b   : > { %260 = vst [vmem:[%s193_s27 + $0x8] sm:$0xff] %v256_v61 }
  0x6c   : > { %597 = shalt.err (!%p594_p10)
}
  0x6d   : > { %s598_s22 = scalar_lea.hbm %s297_s23, 256  ;;  %s602_s17 = scalar_lea.hbm %s906_s2, 1024 }
  0x6e   : > { %p599_p11 = scmp.ne.s32.totalorder %s297_s23, %s598_s22  ;;  %p603_p8 = scmp.lt.s32.totalorder %s297_s23, %s906_s2 }
  0x6f   : > { %p604_p0 = scmp.lt.s32.totalorder %s602_s17, %s598_s22 }
  0x70   : > { %p600_p13 = pnand %p599_p11, %p771_p9 }
  0x71   : > { %p605_p2 = por %p604_p0, %p603_p8 }
  0x72   : > { %p601_p1 = pneg %p600_p13 }
  0x74   : > { %p606_p4 = pnand %p605_p2, %p601_p1 }
  0x76   : > { %609 = shalt.err (!%p606_p4)
}
  0x77   : > { %448 = dma.vmem_to_hbm [thread:$0]  (%p771_p9), %s852_s13, 256, %s297_s23, %s267_s5  }
  0x78 PF: > { %p463_p5 = scmp.ge.s32.totalorder %s684_s16, 2  ;;  %s311_s26 = sand.u32 1, %s656_s9  }
  0x79   : > { %s312_s12 = scalar_lea.sflag [#allocation4], %s311_s26 }
  0x7a   : > { %p456_p3 = pnand %p463_p5, %p777_p12 }
  0x7c   : > { %p457_p6 = pneg %p456_p3 }
  0x7e   : > { %647 = dma.done.wait (%p457_p6), %s312_s12, 256  }
  0x7f   : > { %649 = vsyncadd (%p457_p6), %s312_s12, 4294967040  ;;  %s321_s27 = scalar_lea.sflag [#allocation7], %s311_s26 }
  0x80   : > { %651 = dma.done.wait (%p457_p6), %s321_s27, 256  }
  0x81   : > { %653 = vsyncadd (%p457_p6), %s321_s27, 4294967040  ;;  %s22_s16 = sadd.s32 1, %s684_s16   ;;  %s914_s25 = sld [smem:[#allocation11_spill]] }
  0x82   : > { %p19_p7 = scmp.ge.s32.totalorder %s22_s16, 6   ;;  %s915_s9 = smov %s660_s10 }
  0x83   : > { %s916_s10 = smov %s664_s11  ;;  %s917_s11 = smov %s784_s30 }
  0x84   : > { %s918_s12 = smov %s676_s14  ;;  %s919_s13 = smov %s680_s15 }
  0x85   : > { %s920_s14 = smov %s923_s19  ;;  %21 = sbr.rel (!%p19_p7) target bundleno = 9 (0x9), region = 86 }
  0x87   : > { %s921_s15 = smov %s914_s25 }
  0x8a   :  { %326 = vsyncpa [#allocation3], 1 }
  0x8b   :  { %328 = vsyncpa [#allocation3 + $0x1], 1 }
  0x8c   :  { %329 = vsyncpa [#allocation4], 1 }
  0x8d   :  { %331 = vsyncpa [#allocation4 + $0x1], 1 }
  0x8e   :  { %332 = vsyncpa [#allocation7], 1 }
  0x8f   :  { %334 = vsyncpa [#allocation7 + $0x1], 1 }

</bundles_post_ra>
